<compile_context>
chip_gen: v5e
topology: v5e:2x2
jax: 0.10.0
libtpu: 0.0.40
codegen_flags: <defaults>
</compile_context>

<pallas_src>
import functools

import jax
import jax.numpy as jnp
from jax import lax
from jax.experimental import pallas as pl
from jax.experimental.pallas import tpu as pltpu


_VMEM_LIMIT_BYTES = 48 * 1024 * 1024   # comfortably under v7x's 64 MiB VMEM


def _tpu_kind():
    try:
        return jax.devices()[0].device_kind.lower()
    except Exception:
        return ""


def _default_compute_dtype():
    # bf16 inputs + f32 accumulation: large MXU/DMA win on v6e/v7x.  Keep f32
    # on older / unknown chips to stay bit-tight with the f32 reference.
    kind = _tpu_kind()
    if any(t in kind for t in ("v6", "v7", "tpu7", "7x")):
        return jnp.bfloat16
    return jnp.float32


def _num_tensorcores_hint():
    # v5e / v6e expose one TensorCore per chip; v7x (and older megacore chips)
    # shard "parallel" grid axes across two cores.  Only a tiling preference.
    kind = _tpu_kind()
    if any(t in kind for t in ("v7", "tpu7", "7x", "v4", "v5p")):
        return 2
    return 1


def _build_band_weight(weight_oihw, w, wo, padding):
    """(Cout, Cin, KH, KW) -> block-Toeplitz (KH, W*Cin, Wo*Cout).

    W padding is folded in: band[kh, x*Cin+ci, o*Cout+co] = weight[co,ci,kh,kw]
    when x == o + kw - padding (0 <= x < W), else 0, so that
        out_row(r)[o*Cout+co] = sum_kh  stage_row(r+kh) @ band[kh]
    equals the conv output row laid out as (Wo*Cout,), with stage_row holding
    only the H-padded (not W-padded) input row as (W*Cin,).
    """
    cout, cin, k_h, k_w = weight_oihw.shape
    w_hwio = jnp.transpose(weight_oihw, (2, 3, 1, 0))          # (KH, KW, Cin, Cout)
    o_idx = jnp.arange(wo)[:, None, None]                      # (Wo, 1, 1)
    x_idx = jnp.arange(w)[None, :, None]                       # (1,  W, 1)
    kw_idx = jnp.arange(k_w)[None, None, :]                    # (1,  1, KW)
    sel = (x_idx == o_idx + kw_idx - padding).astype(weight_oihw.dtype)  # (Wo, W, KW)
    band = jnp.einsum("oxk,hkic->hxioc", sel, w_hwio)          # (KH, W, Cin, Wo, Cout)
    return band.reshape(k_h, w * cin, wo * cout)


def _pick_block_batch(nblocks, split, ho, *, total_rows, k_lanes, out_lanes,
                      hp, in_itemsize, out_itemsize, wband_bytes, num_cores,
                      vmem_budget):
    """How many H-chunks to process per grid step (generation-aware)."""
    in_align = 8 * max(1, 4 // in_itemsize)     # 8 for f32, 16 for bf16
    out_align = 8 * max(1, 4 // out_itemsize)

    def valid(tb):
        if nblocks % tb:
            return False
        rows_in, rows_out = tb * split, tb * ho
        if rows_in % in_align and rows_in != total_rows:
            return False
        if rows_out % out_align and tb != nblocks:
            return False
        # Keep the f32 accumulator comfortably inside the vreg file.
        if rows_out * out_lanes * 4 > 128 * 1024:
            return False
        # Double-buffered in/out tiles + staging scratch + (double-buffered) band.
        vmem = (2 * rows_in * k_lanes * in_itemsize
                + 2 * rows_out * out_lanes * out_itemsize
                + tb * hp * k_lanes * in_itemsize
                + 2 * wband_bytes)
        return vmem <= vmem_budget

    cands = [tb for tb in range(1, nblocks + 1) if valid(tb)]
    if not cands:
        return nblocks  # full-extent block always satisfies layout rules
    if num_cores > 1:
        # v7x: prefer >=2 grid steps per core (pipelining), evenly divisible.
        for min_steps in (2 * num_cores, num_cores):
            sub = [tb for tb in cands
                   if nblocks // tb >= min_steps
                   and (nblocks // tb) % num_cores == 0]
            if sub:
                return max(sub)
    # v5e/v6e (single TensorCore): extra grid steps are pure serial overhead.
    return max(cands)


def _focal_conv_kernel(x_ref, wband_ref, o_ref, xpad_ref, *,
                       tb, split, ho, kh_taps, padding):
    """One grid step: the same conv applied to `tb` independent H-chunks.

    x_ref:     (tb*split, W*Cin)    unpadded chunk rows, lane-dense
    wband_ref: (KH, W*Cin, Wo*Cout) block-Toeplitz weights (W padding folded in)
    o_ref:     (tb*ho, Wo*Cout)     lane-dense output rows
    xpad_ref:  (tb, hp, W*Cin)      VMEM scratch: H-padded staging buffer
    """
    k_in = xpad_ref.shape[2]
    hp = xpad_ref.shape[1]

    # Zero only the H halo rows (2*padding sublanes per chunk).  The interior
    # rows are fully overwritten just below, so nothing else needs clearing.
    if padding > 0:
        xpad_ref[:, :padding, :] = jnp.zeros((tb, padding, k_in),
                                             xpad_ref.dtype)
        tail = hp - padding - split
        xpad_ref[:, padding + split:, :] = jnp.zeros((tb, tail, k_in),
                                                     xpad_ref.dtype)

    # Lane-aligned staging store (lane offset 0; W padding lives in wband).
    xpad_ref[:, padding:padding + split, :] = (
        x_ref[...].reshape(tb, split, k_in))

    # Hoist the tap-window loads so the accumulation below is a pure dot+add
    # chain (no VPU/reshape ops between MXU pushes -> v7x MRB accumulation).
    taps = [xpad_ref[:, kh:kh + ho, :].reshape(tb * ho, k_in)
            for kh in range(kh_taps)]
    # TODO(synk): for large Cin/W configs on v6e/v7x, fuse the KH taps into one
    # K = KH*W*Cin matmul (single MXU push per step) if the shifted-window
    # slices show up as sublane-shuffle copies in the bundle dump.
    acc = jnp.dot(taps[0], wband_ref[0], preferred_element_type=jnp.float32)
    for kh in range(1, kh_taps):
        acc = acc + jnp.dot(taps[kh], wband_ref[kh],
                            preferred_element_type=jnp.float32)
    o_ref[...] = acc.astype(o_ref.dtype)


def focal_conv2d(x_nchw, weight_oihw, *, halving, padding, compute_dtype=None):
    """FocalConv2d forward.  x: (N, Cin, H, W), weight: (Cout, Cin, KH, KW)."""
    n, cin, h, w = x_nchw.shape
    cout, _, k_h, k_w = weight_oihw.shape

    nchunks = 2 ** halving
    assert h % nchunks == 0, "H must be divisible by 2**halving"
    split = h // nchunks
    hp = split + 2 * padding
    ho = hp - k_h + 1
    wo = w + 2 * padding - k_w + 1

    if compute_dtype is None:
        compute_dtype = _default_compute_dtype()
    out_dtype = x_nchw.dtype

    # NCHW -> NHWC (one layout pass), then a free reshape folding
    # (N, nchunks, split, W, Cin) into lane-dense rows.
    x_rows = jnp.transpose(x_nchw, (0, 2, 3, 1)).reshape(n * h, w * cin)
    x_rows = x_rows.astype(compute_dtype)
    wband = _build_band_weight(weight_oihw, w, wo, padding).astype(compute_dtype)

    nblocks = n * nchunks
    tb = _pick_block_batch(
        nblocks, split, ho,
        total_rows=n * h, k_lanes=w * cin, out_lanes=wo * cout, hp=hp,
        in_itemsize=jnp.dtype(compute_dtype).itemsize,
        out_itemsize=jnp.dtype(out_dtype).itemsize,
        wband_bytes=wband.size * jnp.dtype(compute_dtype).itemsize,
        num_cores=_num_tensorcores_hint(),
        vmem_budget=int(0.75 * _VMEM_LIMIT_BYTES))
    grid = (nblocks // tb,)

    kernel = functools.partial(
        _focal_conv_kernel, tb=tb, split=split, ho=ho, kh_taps=k_h,
        padding=padding)

    out = pl.pallas_call(
        kernel,
        out_shape=jax.ShapeDtypeStruct((nblocks * ho, wo * cout), out_dtype),
        grid_spec=pltpu.PrefetchScalarGridSpec(
            num_scalar_prefetch=0,
            grid=grid,
            in_specs=[
                pl.BlockSpec((tb * split, w * cin), lambda i: (i, 0)),
                # NOTE: wband's index_map is constant; for large Cin/Cout/W
                # configs add pipeline_mode=pl.Buffered(1) here so the band is
                # not double-buffered against v7x's smaller (64 MiB) VMEM.
                pl.BlockSpec((k_h, w * cin, wo * cout), lambda i: (0, 0, 0)),
            ],
            out_specs=pl.BlockSpec((tb * ho, wo * cout), lambda i: (i, 0)),
            scratch_shapes=[pltpu.VMEM((tb, hp, w * cin), compute_dtype)],
        ),
        compiler_params=pltpu.CompilerParams(
            dimension_semantics=("parallel",),
            vmem_limit_bytes=_VMEM_LIMIT_BYTES),
    )(x_rows, wband)

    # (nblocks*Ho, Wo*Cout) -> (N, nchunks*Ho, Wo, Cout) -> NCHW.
    out = out.reshape(n, nchunks * ho, wo, cout)
    return jnp.transpose(out, (0, 3, 1, 2))


def _reference_focal_conv2d(x_nchw, weight_oihw, *, halving, padding):
    """Pure-JAX reference (lax conv per chunk) for correctness checking."""
    nchunks = 2 ** halving
    chunks = jnp.split(x_nchw, nchunks, axis=2)
    outs = [
        lax.conv_general_dilated(
            c, weight_oihw, window_strides=(1, 1),
            padding=((padding, padding), (padding, padding)),
            dimension_numbers=("NCHW", "OIHW", "NCHW"))
        for c in chunks
    ]
    return jnp.concatenate(outs, axis=2)


if __name__ == "__main__":
    # Module config: FocalConv2d(in_channels=4, out_channels=8, kernel_size=3,
    #                            halving=1, padding=1)
    n, cin, h, w = 2, 4, 16, 16
    cout, k = 8, 3
    halving, padding = 1, 1

    key = jax.random.PRNGKey(0)
    kx, kwt = jax.random.split(key)
    x = jax.random.normal(kx, (n, cin, h, w), dtype=jnp.float32)
    # Deterministic weight init (kaiming-uniform-like range, no checkpoint).
    fan_in = cin * k * k
    bound = (1.0 / fan_in) ** 0.5
    weight = jax.random.uniform(kwt, (cout, cin, k, k), dtype=jnp.float32,
                                minval=-bound, maxval=bound)

    fwd = jax.jit(functools.partial(focal_conv2d, halving=halving,
                                    padding=padding))
    z = fwd(x, weight)
    jax.block_until_ready(z)

    z_ref = _reference_focal_conv2d(x, weight, halving=halving, padding=padding)
    assert z.shape == (n, cout, h, w), z.shape
    # bf16 inputs (v6e/v7x) with f32 accumulation need a looser tolerance.
    tol = 3e-2 if _default_compute_dtype() == jnp.bfloat16 else 1e-5
    err = float(jnp.max(jnp.abs(z - z_ref)))
    assert jnp.allclose(z, z_ref, atol=tol, rtol=tol), err

    print("KERNEL_OK")
</pallas_src>

<mosaic_0001>
module attributes {stable_mosaic.version = 11 : i64} {
  func.func @_focal_conv_kernel(%arg0: i32, %arg1: memref<32x64xf32, #tpu.memory_space<vmem>>, %arg2: memref<3x64x128xf32, #tpu.memory_space<vmem>>, %arg3: memref<32x128xf32, #tpu.memory_space<vmem>>, %arg4: memref<4x10x64xf32, #tpu.memory_space<vmem>>) attributes {dimension_semantics = [#tpu.dimension_semantics<parallel>], iteration_bounds = array<i64: 1>, scalar_prefetch = 0 : i64, scratch_operands = 1 : i64, tpu.core_type = #tpu.core_type<tc>, window_params = [{transform_indices = @transform_0, window_bounds = array<i64: 32, 64>}, {pipeline_mode = #tpu.pipeline_mode<synchronous>, transform_indices = @transform_1, window_bounds = array<i64: 3, 64, 128>}, {transform_indices = @transform_2, window_bounds = array<i64: 32, 128>}]} {
    %cst = arith.constant 0.000000e+00 : f32
    %0 = vector.broadcast %cst : f32 to vector<4x1x64xf32>
    %c0 = arith.constant 0 : index
    %c0_0 = arith.constant 0 : index
    %c0_1 = arith.constant 0 : index
    %1 = vector.load %arg4[%c0, %c0_0, %c0_1] : memref<4x10x64xf32, #tpu.memory_space<vmem>>, vector<4x1x64xf32>
    tpu.vector_store %arg4[%c0, %c0_0, %c0_1], %0 {strides = array<i32>} : memref<4x10x64xf32, #tpu.memory_space<vmem>>, vector<4x1x64xf32>,
    %cst_2 = arith.constant 0.000000e+00 : f32
    %2 = vector.broadcast %cst_2 : f32 to vector<4x1x64xf32>
    %c0_3 = arith.constant 0 : index
    %c9 = arith.constant 9 : index
    %c0_4 = arith.constant 0 : index
    %3 = vector.load %arg4[%c0_3, %c9, %c0_4] : memref<4x10x64xf32, #tpu.memory_space<vmem>>, vector<4x1x64xf32>
    tpu.vector_store %arg4[%c0_3, %c9, %c0_4], %2 {strides = array<i32>} : memref<4x10x64xf32, #tpu.memory_space<vmem>>, vector<4x1x64xf32>,
    %c0_5 = arith.constant 0 : index
    %c0_6 = arith.constant 0 : index
    %4 = vector.load %arg1[%c0_5, %c0_6] : memref<32x64xf32, #tpu.memory_space<vmem>>, vector<32x64xf32>
    %5 = vector.shape_cast %4 : vector<32x64xf32> to vector<4x8x64xf32>
    %c0_7 = arith.constant 0 : index
    %c1 = arith.constant 1 : index
    %c0_8 = arith.constant 0 : index
    %6 = vector.load %arg4[%c0_7, %c1, %c0_8] : memref<4x10x64xf32, #tpu.memory_space<vmem>>, vector<4x8x64xf32>
    tpu.vector_store %arg4[%c0_7, %c1, %c0_8], %5 {strides = array<i32>} : memref<4x10x64xf32, #tpu.memory_space<vmem>>, vector<4x8x64xf32>,
    %c0_9 = arith.constant 0 : index
    %c0_10 = arith.constant 0 : index
    %c0_11 = arith.constant 0 : index
    %7 = vector.load %arg4[%c0_9, %c0_10, %c0_11] : memref<4x10x64xf32, #tpu.memory_space<vmem>>, vector<4x8x64xf32>
    %8 = vector.shape_cast %7 : vector<4x8x64xf32> to vector<32x64xf32>
    %c0_12 = arith.constant 0 : index
    %c1_13 = arith.constant 1 : index
    %c0_14 = arith.constant 0 : index
    %9 = vector.load %arg4[%c0_12, %c1_13, %c0_14] : memref<4x10x64xf32, #tpu.memory_space<vmem>>, vector<4x8x64xf32>
    %10 = vector.shape_cast %9 : vector<4x8x64xf32> to vector<32x64xf32>
    %c0_15 = arith.constant 0 : index
    %c2 = arith.constant 2 : index
    %c0_16 = arith.constant 0 : index
    %11 = vector.load %arg4[%c0_15, %c2, %c0_16] : memref<4x10x64xf32, #tpu.memory_space<vmem>>, vector<4x8x64xf32>
    %12 = vector.shape_cast %11 : vector<4x8x64xf32> to vector<32x64xf32>
    %c0_17 = arith.constant 0 : index
    %c0_18 = arith.constant 0 : index
    %c0_19 = arith.constant 0 : index
    %13 = vector.load %arg2[%c0_17, %c0_18, %c0_19] : memref<3x64x128xf32, #tpu.memory_space<vmem>>, vector<1x64x128xf32>
    %14 = vector.shape_cast %13 : vector<1x64x128xf32> to vector<64x128xf32>
    %cst_20 = arith.constant dense<0.000000e+00> : vector<32x128xf32>
    %15 = tpu.matmul %8, %14, %cst_20 {dimension_numbers = #tpu.dot_dimension_numbers<[1], [0], [0], [1], [0, 0, 1, 1], [], []>} : vector<32x64xf32>, vector<64x128xf32>, vector<32x128xf32> -> vector<32x128xf32>
    %c1_21 = arith.constant 1 : index
    %c0_22 = arith.constant 0 : index
    %c0_23 = arith.constant 0 : index
    %16 = vector.load %arg2[%c1_21, %c0_22, %c0_23] : memref<3x64x128xf32, #tpu.memory_space<vmem>>, vector<1x64x128xf32>
    %17 = vector.shape_cast %16 : vector<1x64x128xf32> to vector<64x128xf32>
    %cst_24 = arith.constant dense<0.000000e+00> : vector<32x128xf32>
    %18 = tpu.matmul %10, %17, %cst_24 {dimension_numbers = #tpu.dot_dimension_numbers<[1], [0], [0], [1], [0, 0, 1, 1], [], []>} : vector<32x64xf32>, vector<64x128xf32>, vector<32x128xf32> -> vector<32x128xf32>
    %19 = arith.addf %15, %18 : vector<32x128xf32>
    %c2_25 = arith.constant 2 : index
    %c0_26 = arith.constant 0 : index
    %c0_27 = arith.constant 0 : index
    %20 = vector.load %arg2[%c2_25, %c0_26, %c0_27] : memref<3x64x128xf32, #tpu.memory_space<vmem>>, vector<1x64x128xf32>
    %21 = vector.shape_cast %20 : vector<1x64x128xf32> to vector<64x128xf32>
    %cst_28 = arith.constant dense<0.000000e+00> : vector<32x128xf32>
    %22 = tpu.matmul %12, %21, %cst_28 {dimension_numbers = #tpu.dot_dimension_numbers<[1], [0], [0], [1], [0, 0, 1, 1], [], []>} : vector<32x64xf32>, vector<64x128xf32>, vector<32x128xf32> -> vector<32x128xf32>
    %23 = arith.addf %19, %22 : vector<32x128xf32>
    %c0_29 = arith.constant 0 : index
    %c0_30 = arith.constant 0 : index
    %24 = vector.load %arg3[%c0_29, %c0_30] : memref<32x128xf32, #tpu.memory_space<vmem>>, vector<32x128xf32>
    tpu.vector_store %arg3[%c0_29, %c0_30], %23 {strides = array<i32>} : memref<32x128xf32, #tpu.memory_space<vmem>>, vector<32x128xf32>,
    return
  }
  func.func @transform_0(%arg0: i32) -> (i32, i32) {
    %c0_i32 = arith.constant 0 : i32
    %c0_i32_0 = arith.constant 0 : i32
    return %arg0, %c0_i32 : i32, i32
  }
  func.func @transform_1(%arg0: i32) -> (i32, i32, i32) {
    %c0_i32 = arith.constant 0 : i32
    %c0_i32_0 = arith.constant 0 : i32
    %c0_i32_1 = arith.constant 0 : i32
    %c0_i32_2 = arith.constant 0 : i32
    return %c0_i32, %c0_i32_0, %c0_i32_1 : i32, i32, i32
  }
  func.func @transform_2(%arg0: i32) -> (i32, i32) {
    %c0_i32 = arith.constant 0 : i32
    %c0_i32_0 = arith.constant 0 : i32
    return %arg0, %c0_i32 : i32, i32
  }
}

</mosaic_0001>

<bundles_post_ra>
// kernel: focal_conv2d.1
= control target key start
LH: loop header
LB: loop body
LE: loop exit
PB: predicated region body
PF: predicated region fallthrough
CT: control target
= control target key end

     0   :  { %vm11_vm0 = vcmask 516096   ;;  %v239_v3 = vmov 0.0   ;;  %vm24_vm1 = vcmask 523264   ;;  %s375_s1 = inlined_call_operand.vmem [shape: f32[3,64,128], index: 1, kind: input, shape index: {}]   ;;  %s376_s0 = inlined_call_operand.vmem [shape: f32[32,64], index: 0, kind: input, shape index: {}]   ;;  %s377_s2 = inlined_call_operand.vmem [shape: f32[32,128], index: 2, kind: output, shape index: {}]  }
   0x1   :  { %v225_v0 = vld [vmem:[%s375_s1 + $0xb8] sm:$0xff]  ;;  %v224_v1 = vld [vmem:[%s375_s1 + $0xb0] sm:$0xff]  ;;  %16 = vst.msk [vmem:[#allocation2 + $0x9] sm:$0x1] %vm11_vm0, %v239_v3  ;;  %v223_v6 = vld [vmem:[%s375_s1 + $0xa8] sm:$0xff] }
   0x2   :  { %v209_v2 = vld [vmem:[%s375_s1 + $0x78] sm:$0xff]  ;;  %169 = vmatpush.msra.mxu2 %v225_v0  ;;  %v208_v5 = vld [vmem:[%s375_s1 + $0x70] sm:$0xff]  ;;  %12 = vst.msk [vmem:[#allocation2] sm:$0x1] %vm11_vm0, %v239_v3  ;;  %v207_v8 = vld [vmem:[%s375_s1 + $0x68] sm:$0xff] }
   0x3   :  { %78 = vmatpush.msra.mxu0 %v209_v2  ;;  %v48_v4 = vld [vmem:[%s375_s1 + $0x38] sm:$0xff]  ;;  %230 = vmatpush.msra.mxu3 %v209_v2  ;;  %v47_v7 = vld [vmem:[%s375_s1 + $0x30] sm:$0xff]  ;;  %13 = vst.msk [vmem:[#allocation2 + $0x10] sm:$0x1] %vm11_vm0, %v239_v3  ;;  %v46_v9 = vld [vmem:[%s375_s1 + $0x28] sm:$0xff] }
   0x4   :  { %119 = vmatpush.msra.mxu1 %v48_v4  ;;  %170 = vmatpush.msra.mxu2 %v224_v1  ;;  %14 = vst.msk [vmem:[#allocation2 + $0x20] sm:$0x1] %vm11_vm0, %v239_v3  ;;  %v222_v10 = vld [vmem:[%s375_s1 + $0xa0] sm:$0xff]  ;;  %v221_v13 = vld [vmem:[%s375_s1 + $0x98] sm:$0xff]  ;;  %v220_v16 = vld [vmem:[%s375_s1 + $0x90] sm:$0xff] }
   0x5   :  { %79 = vmatpush.msra.mxu0 %v208_v5  ;;  %231 = vmatpush.msra.mxu3 %v208_v5  ;;  %v206_v11 = vld [vmem:[%s375_s1 + $0x60] sm:$0xff]  ;;  %15 = vst.msk [vmem:[#allocation2 + $0x30] sm:$0x1] %vm11_vm0, %v239_v3  ;;  %v205_v14 = vld [vmem:[%s375_s1 + $0x58] sm:$0xff]  ;;  %v204_v18 = vld [vmem:[%s375_s1 + $0x50] sm:$0xff] }
   0x6   :  { %120 = vmatpush.msra.mxu1 %v47_v7  ;;  %171 = vmatpush.msra.mxu2 %v223_v6  ;;  %v45_v12 = vld [vmem:[%s375_s1 + $0x20] sm:$0xff]  ;;  %17 = vst.msk [vmem:[#allocation2 + $0x19] sm:$0x1] %vm11_vm0, %v239_v3  ;;  %v44_v17 = vld [vmem:[%s375_s1 + $0x18] sm:$0xff]  ;;  %v21_v19 = vld [vmem:[%s376_s0 + $0x8] sm:$0xff] }
   0x7   :  { %80 = vmatpush.msra.mxu0 %v207_v8  ;;  %232 = vmatpush.msra.mxu3 %v207_v8  ;;  %v20_v15 = vld [vmem:[%s376_s0] sm:$0xff]  ;;  %18 = vst.msk [vmem:[#allocation2 + $0x29] sm:$0x1] %vm11_vm0, %v239_v3  ;;  %v22_v20 = vld [vmem:[%s376_s0 + $0x10] sm:$0xff]  ;;  %v23_v22 = vld [vmem:[%s376_s0 + $0x18] sm:$0xff] }
   0x8   :  { %121 = vmatpush.msra.mxu1 %v46_v9  ;;  %172 = vmatpush.msra.mxu2 %v222_v10  ;;  %25 = vst.msk [vmem:[#allocation2 + $0x1] sm:$0xff] %vm24_vm1, %v20_v15  ;;  %v43_v21 = vld [vmem:[%s375_s1 + $0x10] sm:$0xff]  ;;  %v219_v23 = vld [vmem:[%s375_s1 + $0x88] sm:$0xff]  ;;  %v218_v26 = vld [vmem:[%s375_s1 + $0x80] sm:$0xff] }
   0x9   :  { %81 = vmatpush.msra.mxu0 %v206_v11  ;;  %233 = vmatpush.msra.mxu3 %v206_v11  ;;  %19 = vst.msk [vmem:[#allocation2 + $0x39] sm:$0x1] %vm11_vm0, %v239_v3  ;;  %v203_v24 = vld [vmem:[%s375_s1 + $0x48] sm:$0xff]  ;;  %v202_v27 = vld [vmem:[%s375_s1 + $0x40] sm:$0xff] }
   0xa   :  { %122 = vmatpush.msra.mxu1 %v45_v12  ;;  %173 = vmatpush.msra.mxu2 %v221_v13  ;;  %26 = vst.msk [vmem:[#allocation2 + $0x11] sm:$0xff] %vm24_vm1, %v21_v19  ;;  %v42_v25 = vld [vmem:[%s375_s1 + $0x8] sm:$0xff]  ;;  %v41_v28 = vld [vmem:[%s375_s1] sm:$0xff] }
   0xb   :  { %82 = vmatpush.msra.mxu0 %v205_v14  ;;  %234 = vmatpush.msra.mxu3 %v205_v14  ;;  %27 = vst.msk [vmem:[#allocation2 + $0x21] sm:$0xff] %vm24_vm1, %v22_v20 }
   0xc   :  { %123 = vmatpush.msra.mxu1 %v44_v17  ;;  %174 = vmatpush.msra.mxu2 %v220_v16  ;;  %28 = vst.msk [vmem:[#allocation2 + $0x31] sm:$0xff] %vm24_vm1, %v23_v22 }
   0xd   :  { %83 = vmatpush.msra.mxu0 %v204_v18  ;;  %235 = vmatpush.msra.mxu3 %v204_v18 }
   0xe   :  { %124 = vmatpush.msra.mxu1 %v43_v21  ;;  %175 = vmatpush.msra.mxu2 %v219_v23 }
   0xf   :  { %84 = vmatpush.msra.mxu0 %v203_v24  ;;  %v37_v29 = vld [vmem:[#allocation2 + $0x2] sm:$0xff]  ;;  %236 = vmatpush.msra.mxu3 %v203_v24 }
  0x10   :  { %125 = vmatpush.msra.mxu1 %v42_v25  ;;  %v33_v30 = vld [vmem:[#allocation2 + $0x1] sm:$0xff]  ;;  %176 = vmatpush.msra.mxu2 %v218_v26 }
  0x11   :  { %v29_v31 = vld [vmem:[#allocation2] sm:$0xff]  ;;  %85 = vmatpush.msra.mxu0 %v202_v27  ;;  %226 = vmatmul.msk.f32.vlgmr.msra.gmra.mxu2 %vm24_vm1, %v37_v29  ;;  %v34_v32 = vld [vmem:[#allocation2 + $0x11] sm:$0xff] }
  0x12   :  { %126 = vmatpush.msra.mxu1 %v41_v28  ;;  %210 = vmatmul.msk.f32.vlgmr.msra.gmra.mxu0 %vm24_vm1, %v33_v30  ;;  %v38_v33 = vld [vmem:[#allocation2 + $0x12] sm:$0xff]  ;;  %v35_v35 = vld [vmem:[#allocation2 + $0x21] sm:$0xff] }
  0x13   :  { %214 = vmatmul.msk.f32.vlgmr.msra.gmra.mxu1 %vm24_vm1, %v29_v31  ;;  %237 = vmatpush.msra.mxu3 %v202_v27  ;;  %v30_v34 = vld [vmem:[#allocation2 + $0x10] sm:$0xff]  ;;  %v39_v36 = vld [vmem:[#allocation2 + $0x22] sm:$0xff] }
  0x14   :  { %211 = vmatmul.msk.f32.vlgmr.msra.gmra.mxu3 %vm24_vm1, %v34_v32  ;;  %v31_v37 = vld [vmem:[#allocation2 + $0x20] sm:$0xff]  ;;  %v36_v38 = vld [vmem:[#allocation2 + $0x31] sm:$0xff] }
  0x15   :  { %v40_v39 = vld [vmem:[#allocation2 + $0x32] sm:$0xff] }
  0x16   :  { %v32_v40 = vld [vmem:[#allocation2 + $0x30] sm:$0xff] }
  0x19   :  { %227 = vmatmul.msk.f32.gmra.mxu2 %vm24_vm1, %v38_v33 }
  0x1b   :  { %215 = vmatmul.msk.f32.gmra.mxu1 %vm24_vm1, %v30_v34 }
  0x1c   :  { %212 = vmatmul.msk.f32.gmra.mxu3 %vm24_vm1, %v35_v35 }
  0x21   :  { %228 = vmatmul.msk.f32.gmra.mxu2 %vm24_vm1, %v39_v36 }
  0x23   :  { %216 = vmatmul.msk.f32.gmra.mxu1 %vm24_vm1, %v31_v37 }
  0x24   :  { %213 = vmatmul.msk.f32.gmra.mxu3 %vm24_vm1, %v36_v38 }
  0x29   :  { %229 = vmatmul.msk.f32.gmra.mxu2 %vm24_vm1, %v40_v39 }
  0x2b   :  { %217 = vmatmul.msk.f32.gmra.mxu1 %vm24_vm1, %v32_v40 }
  0x8f   :  { %v87_v41 = vpop.f32.mrf.mxu0 }
  0x90   :  { %v128_v42 = vpop.f32.mrf.mxu1 }
  0x91   :  { %v129_v43 = vadd.f32 %v128_v42, %v87_v41 }
  0x94   :  { %v178_v44 = vpop.f32.mrf.mxu2 }
  0x95   :  { %v190_v45 = vadd.f32 %v178_v44, %v129_v43 }
  0x97   :  { %194 = vst [vmem:[%s377_s2] sm:$0xff] %v190_v45  ;;  %v90_v46 = vpop.f32.mrf.mxu3 }
  0x98   :  { %v131_v47 = vpop.f32.mrf.mxu1 }
  0x99   :  { %v132_v48 = vadd.f32 %v131_v47, %v90_v46 }
  0x9c   :  { %v181_v49 = vpop.f32.mrf.mxu2 }
  0x9d   :  { %v191_v50 = vadd.f32 %v181_v49, %v132_v48 }
  0x9f   :  { %195 = vst [vmem:[%s377_s2 + $0x8] sm:$0xff] %v191_v50  ;;  %v93_v51 = vpop.f32.mrf.mxu3 }
  0xa0   :  { %v134_v52 = vpop.f32.mrf.mxu1 }
  0xa1   :  { %v135_v53 = vadd.f32 %v134_v52, %v93_v51 }
  0xa4   :  { %v184_v54 = vpop.f32.mrf.mxu2 }
  0xa5   :  { %v192_v55 = vadd.f32 %v184_v54, %v135_v53 }
  0xa7   :  { %196 = vst [vmem:[%s377_s2 + $0x10] sm:$0xff] %v192_v55  ;;  %v96_v56 = vpop.f32.mrf.mxu3 }
  0xa8   :  { %v137_v57 = vpop.f32.mrf.mxu1 }
  0xa9   :  { %v138_v58 = vadd.f32 %v137_v57, %v96_v56 }
  0xac   :  { %v187_v59 = vpop.f32.mrf.mxu2 }
  0xad   :  { %v193_v60 = vadd.f32 %v187_v59, %v138_v58 }
  0xaf   :  { %197 = vst [vmem:[%s377_s2 + $0x18] sm:$0xff] %v193_v60 }

</bundles_post_ra>
